<compile_context>
chip_gen: v6e
topology: v6e:2x2x1
jax: 0.10.0
libtpu: 0.0.40
codegen_flags: <defaults>
</compile_context>

<pallas_src>
import functools

import jax
import jax.numpy as jnp
from jax.experimental import pallas as pl
from jax.experimental.pallas import tpu as pltpu

HIDDEN1 = 400
HIDDEN2 = 200
OBS_PAD = 128    # obs_size (8) -> 128: lane-dense x tile, clean K for the MXU
H1_PAD = 512     # 400 -> 512  (multiple of 128)
H2_PAD = 256     # 200 -> 256
ACT_PAD = 128    # n_actions -> 128 (lane-dense, unmasked output vst)


def _round_up(n, m):
    return ((n + m - 1) // m) * m


def _pad_to(arr, shape):
    pads = [(0, t - s) for s, t in zip(arr.shape, shape)]
    return jnp.pad(arr, pads)


def qfunction_kernel(x_ref, w1_ref, b1_ref, w2_ref, b2_ref, w3_ref, b3_ref,
                     q_ref, qmax_ref, act_ref, *, n_actions):
    # Layer 1: Linear(OBS_PAD -> H1_PAD) + ReLU.  bf16 MXU inputs, f32 accumulate;
    # activations cast back to bf16 at the production site so inter-layer
    # temporaries are bf16.
    h = jnp.dot(x_ref[...], w1_ref[...], preferred_element_type=jnp.float32)
    h = jnp.maximum(h + b1_ref[...], 0.0).astype(jnp.bfloat16)
    # Layer 2: Linear(H1_PAD -> H2_PAD) + ReLU
    h = jnp.dot(h, w2_ref[...], preferred_element_type=jnp.float32)
    h = jnp.maximum(h + b2_ref[...], 0.0).astype(jnp.bfloat16)
    # Layer 3: Linear(H2_PAD -> ACT_PAD), raw Q-values (padded action lanes are 0)
    q = jnp.dot(h, w3_ref[...], preferred_element_type=jnp.float32) + b3_ref[...]
    q_ref[...] = q.astype(q_ref.dtype)

    # Fused DiscreteActionValue greedy epilogue: per-row max Q and greedy action.
    # Padded action lanes are masked to -inf before the reductions.  All reductions
    # are row-wise, so out-of-bounds batch rows (batch < tb) stay harmless and are
    # dropped by the masked output stores.
    lane = jax.lax.broadcasted_iota(jnp.int32, q.shape, 1)
    qm = jnp.where(lane < n_actions, q, -jnp.inf)
    qmax = jnp.max(qm, axis=-1, keepdims=True)
    cand = jnp.where(qm >= qmax, lane, q.shape[-1])       # smallest argmax index
    act_ref[...] = jnp.min(cand, axis=-1, keepdims=True).astype(jnp.int32)
    qmax_ref[...] = qmax.astype(qmax_ref.dtype)


def prepare_params(w1, b1, w2, b2, w3, b3, weight_dtype=jnp.bfloat16):
    """Zero-pad to 128-aligned widths and cast weights, once, outside the hot path.

    Padding is exact: padded bias entries and weight rows/columns are zero, so
    padded hidden lanes are relu(0) = 0 and contribute nothing downstream.
    Pass weight_dtype=jnp.float32 if exact TD-target fidelity is required.
    """
    obs_size = w1.shape[0]
    assert obs_size <= OBS_PAD
    w1p = _pad_to(w1, (OBS_PAD, H1_PAD)).astype(weight_dtype)
    b1p = _pad_to(b1, (1, H1_PAD)).astype(jnp.float32)
    w2p = _pad_to(w2, (H1_PAD, H2_PAD)).astype(weight_dtype)
    b2p = _pad_to(b2, (1, H2_PAD)).astype(jnp.float32)
    w3p = _pad_to(w3, (H2_PAD, ACT_PAD)).astype(weight_dtype)
    b3p = _pad_to(b3, (1, ACT_PAD)).astype(jnp.float32)
    return w1p, b1p, w2p, b2p, w3p, b3p


def _pick_batch_tile(batch):
    b = _round_up(max(batch, 1), 16)          # bf16 sublane pack: 16 rows / vreg
    if b <= 1024:
        return b                              # single grid step (acting / small)
    # Large training batches: ~2 grid steps so the "parallel" batch axis engages
    # both v7x TensorCores; cap the per-step tile at 2048 (VMEM footprint is a few
    # MB, far below limits on every generation).
    return min(2048, _round_up(pl.cdiv(b, 2), 256))


@functools.partial(jax.jit, static_argnames=("n_actions",))
def qfunction_forward(x, w1p, b1p, w2p, b2p, w3p, b3p, *, n_actions):
    batch, obs_size = x.shape
    tb = _pick_batch_tile(batch)
    grid = (pl.cdiv(batch, tb),)

    # Pad the feature dim to OBS_PAD (exact: padded w1 rows are zero) and cast to
    # bf16 so layer 1 has unmasked, lane-dense MXU operands.
    xp = _pad_to(x, (batch, OBS_PAD)).astype(jnp.bfloat16)

    kernel = functools.partial(qfunction_kernel, n_actions=n_actions)

    q_padded, q_max, greedy = pl.pallas_call(
        kernel,
        out_shape=(
            jax.ShapeDtypeStruct((batch, ACT_PAD), jnp.float32),   # Q-values (padded)
            jax.ShapeDtypeStruct((batch, 1), jnp.float32),         # max Q
            jax.ShapeDtypeStruct((batch, 1), jnp.int32),           # greedy action
        ),
        grid=grid,
        in_specs=[
            pl.BlockSpec((tb, OBS_PAD), lambda i: (i, 0)),   # x: tiled over batch
            # Weights/biases: constant index_map -> same block every grid step, so
            # they are DMA'd once and stay VMEM-resident across the batch grid.
            # (pipeline_mode=pl.Buffered(1) would also drop the redundant second
            #  buffer, ~340 KB; omitted for lowering compatibility.)
            pl.BlockSpec(w1p.shape, lambda i: (0, 0)),
            pl.BlockSpec(b1p.shape, lambda i: (0, 0)),
            pl.BlockSpec(w2p.shape, lambda i: (0, 0)),
            pl.BlockSpec(b2p.shape, lambda i: (0, 0)),
            pl.BlockSpec(w3p.shape, lambda i: (0, 0)),
            pl.BlockSpec(b3p.shape, lambda i: (0, 0)),
        ],
        out_specs=(
            pl.BlockSpec((tb, ACT_PAD), lambda i: (i, 0)),   # lane-dense f32 store
            pl.BlockSpec((tb, 1), lambda i: (i, 0)),
            pl.BlockSpec((tb, 1), lambda i: (i, 0)),
        ),
        compiler_params=pltpu.CompilerParams(
            dimension_semantics=("parallel",),               # megacore on v7x
        ),
    )(xp, w1p, b1p, w2p, b2p, w3p, b3p)

    # Real action columns (padded lanes are exactly zero); max/argmax already fused.
    return q_padded[:, :n_actions], q_max[:, 0], greedy[:, 0]


def init_linear_params(key, in_features, out_features):
    """PyTorch nn.Linear default init: U(-1/sqrt(in), 1/sqrt(in))."""
    k_w, k_b = jax.random.split(key)
    bound = 1.0 / jnp.sqrt(jnp.asarray(in_features, jnp.float32))
    # Stored already transposed: (in_features, out_features)
    w = jax.random.uniform(
        k_w, (in_features, out_features), jnp.float32, minval=-bound, maxval=bound
    )
    b = jax.random.uniform(
        k_b, (1, out_features), jnp.float32, minval=-bound, maxval=bound
    )
    return w, b


if __name__ == "__main__":
    # LunarLander-v2: obs_size = 8, n_actions = 4
    obs_size = 8
    n_actions = 4
    batch = 2

    key = jax.random.PRNGKey(0)
    k_x, k1, k2, k3 = jax.random.split(key, 4)

    x = jax.random.normal(k_x, (batch, obs_size), jnp.float32)
    w1, b1 = init_linear_params(k1, obs_size, HIDDEN1)
    w2, b2 = init_linear_params(k2, HIDDEN1, HIDDEN2)
    w3, b3 = init_linear_params(k3, HIDDEN2, n_actions)

    # Pad/cast once outside the per-call path (weights are reused across calls).
    params = prepare_params(w1, b1, w2, b2, w3, b3)

    q, q_max, greedy = qfunction_forward(x, *params, n_actions=n_actions)
    q, q_max, greedy = jax.block_until_ready((q, q_max, greedy))

    # Pure-JAX f32 reference (bf16 weights/activations -> loosened tolerance).
    h_ref = jnp.maximum(x @ w1 + b1, 0.0)
    h_ref = jnp.maximum(h_ref @ w2 + b2, 0.0)
    q_ref = h_ref @ w3 + b3

    assert q.shape == (batch, n_actions)
    assert jnp.allclose(q, q_ref, atol=5e-2, rtol=5e-2), (q, q_ref)
    # Fused DiscreteActionValue epilogue must be self-consistent with the Q output.
    assert jnp.array_equal(greedy, jnp.argmax(q, axis=-1)), (greedy, q)
    assert jnp.allclose(q_max, jnp.max(q, axis=-1), atol=1e-6), (q_max, q)

    # TODO(synk): pfrl.action_value.DiscreteActionValue is a Python wrapper object;
    # the kernel returns its contents (raw Q-values + fused greedy action / max Q).
    print("KERNEL_OK")
</pallas_src>

<mosaic_0001>
module attributes {stable_mosaic.version = 11 : i64} {
  func.func @qfunction_kernel(%arg0: i32, %arg1: memref<16x128xbf16, #tpu.memory_space<vmem>>, %arg2: memref<128x512xbf16, #tpu.memory_space<vmem>>, %arg3: memref<1x512xf32, #tpu.memory_space<vmem>>, %arg4: memref<512x256xbf16, #tpu.memory_space<vmem>>, %arg5: memref<1x256xf32, #tpu.memory_space<vmem>>, %arg6: memref<256x128xbf16, #tpu.memory_space<vmem>>, %arg7: memref<1x128xf32, #tpu.memory_space<vmem>>, %arg8: memref<16x128xf32, #tpu.memory_space<vmem>>, %arg9: memref<16x1xf32, #tpu.memory_space<vmem>>, %arg10: memref<16x1xi32, #tpu.memory_space<vmem>>) attributes {dimension_semantics = [#tpu.dimension_semantics<parallel>], iteration_bounds = array<i64: 1>, scalar_prefetch = 0 : i64, scratch_operands = 0 : i64, tpu.core_type = #tpu.core_type<tc>, window_params = [{transform_indices = @transform_0, window_bounds = array<i64: 16, 128>}, {pipeline_mode = #tpu.pipeline_mode<synchronous>, transform_indices = @transform_1, window_bounds = array<i64: 128, 512>}, {pipeline_mode = #tpu.pipeline_mode<synchronous>, transform_indices = @transform_2, window_bounds = array<i64: 1, 512>}, {pipeline_mode = #tpu.pipeline_mode<synchronous>, transform_indices = @transform_3, window_bounds = array<i64: 512, 256>}, {pipeline_mode = #tpu.pipeline_mode<synchronous>, transform_indices = @transform_4, window_bounds = array<i64: 1, 256>}, {pipeline_mode = #tpu.pipeline_mode<synchronous>, transform_indices = @transform_5, window_bounds = array<i64: 256, 128>}, {pipeline_mode = #tpu.pipeline_mode<synchronous>, transform_indices = @transform_6, window_bounds = array<i64: 1, 128>}, {transform_indices = @transform_7, window_bounds = array<i64: 16, 128>}, {transform_indices = @transform_8, window_bounds = array<i64: 16, 1>}, {transform_indices = @transform_9, window_bounds = array<i64: 16, 1>}]} {
    %c0 = arith.constant 0 : index
    %c0_0 = arith.constant 0 : index
    %0 = vector.load %arg1[%c0, %c0_0] : memref<16x128xbf16, #tpu.memory_space<vmem>>, vector<16x128xbf16>
    %c0_1 = arith.constant 0 : index
    %c0_2 = arith.constant 0 : index
    %1 = vector.load %arg2[%c0_1, %c0_2] : memref<128x512xbf16, #tpu.memory_space<vmem>>, vector<128x512xbf16>
    %cst = arith.constant dense<0.000000e+00> : vector<16x512xf32>
    %2 = tpu.matmul %0, %1, %cst {dimension_numbers = #tpu.dot_dimension_numbers<[1], [0], [0], [1], [0, 0, 1, 1], [], []>} : vector<16x128xbf16>, vector<128x512xbf16>, vector<16x512xf32> -> vector<16x512xf32>
    %c0_3 = arith.constant 0 : index
    %c0_4 = arith.constant 0 : index
    %3 = vector.load %arg3[%c0_3, %c0_4] : memref<1x512xf32, #tpu.memory_space<vmem>>, vector<1x512xf32>
    %4 = vector.broadcast %3 : vector<1x512xf32> to vector<16x512xf32>
    %5 = arith.addf %2, %4 : vector<16x512xf32>
    %cst_5 = arith.constant 0.000000e+00 : f32
    %6 = vector.broadcast %cst_5 : f32 to vector<16x512xf32>
    %7 = arith.maximumf %5, %6 : vector<16x512xf32>
    %8 = arith.truncf %7 : vector<16x512xf32> to vector<16x512xbf16>
    %c0_6 = arith.constant 0 : index
    %c0_7 = arith.constant 0 : index
    %9 = vector.load %arg4[%c0_6, %c0_7] : memref<512x256xbf16, #tpu.memory_space<vmem>>, vector<512x256xbf16>
    %cst_8 = arith.constant dense<0.000000e+00> : vector<16x256xf32>
    %10 = tpu.matmul %8, %9, %cst_8 {dimension_numbers = #tpu.dot_dimension_numbers<[1], [0], [0], [1], [0, 0, 1, 1], [], []>} : vector<16x512xbf16>, vector<512x256xbf16>, vector<16x256xf32> -> vector<16x256xf32>
    %c0_9 = arith.constant 0 : index
    %c0_10 = arith.constant 0 : index
    %11 = vector.load %arg5[%c0_9, %c0_10] : memref<1x256xf32, #tpu.memory_space<vmem>>, vector<1x256xf32>
    %12 = vector.broadcast %11 : vector<1x256xf32> to vector<16x256xf32>
    %13 = arith.addf %10, %12 : vector<16x256xf32>
    %cst_11 = arith.constant 0.000000e+00 : f32
    %14 = vector.broadcast %cst_11 : f32 to vector<16x256xf32>
    %15 = arith.maximumf %13, %14 : vector<16x256xf32>
    %16 = arith.truncf %15 : vector<16x256xf32> to vector<16x256xbf16>
    %c0_12 = arith.constant 0 : index
    %c0_13 = arith.constant 0 : index
    %17 = vector.load %arg6[%c0_12, %c0_13] : memref<256x128xbf16, #tpu.memory_space<vmem>>, vector<256x128xbf16>
    %cst_14 = arith.constant dense<0.000000e+00> : vector<16x128xf32>
    %18 = tpu.matmul %16, %17, %cst_14 {dimension_numbers = #tpu.dot_dimension_numbers<[1], [0], [0], [1], [0, 0, 1, 1], [], []>} : vector<16x256xbf16>, vector<256x128xbf16>, vector<16x128xf32> -> vector<16x128xf32>
    %c0_15 = arith.constant 0 : index
    %c0_16 = arith.constant 0 : index
    %19 = vector.load %arg7[%c0_15, %c0_16] : memref<1x128xf32, #tpu.memory_space<vmem>>, vector<1x128xf32>
    %20 = vector.broadcast %19 : vector<1x128xf32> to vector<16x128xf32>
    %21 = arith.addf %18, %20 : vector<16x128xf32>
    %c0_17 = arith.constant 0 : index
    %c0_18 = arith.constant 0 : index
    %22 = vector.load %arg8[%c0_17, %c0_18] : memref<16x128xf32, #tpu.memory_space<vmem>>, vector<16x128xf32>
    tpu.vector_store %arg8[%c0_17, %c0_18], %21 {strides = array<i32>} : memref<16x128xf32, #tpu.memory_space<vmem>>, vector<16x128xf32>,
    %23 = tpu.iota {dimensions = array<i32: 1>} : vector<16x128xi32>
    %c4_i32 = arith.constant 4 : i32
    %24 = vector.broadcast %c4_i32 : i32 to vector<16x128xi32>
    %25 = arith.cmpi slt, %23, %24 : vector<16x128xi32>
    %cst_19 = arith.constant 0xFF800000 : f32
    %26 = vector.broadcast %cst_19 : f32 to vector<16x128xf32>
    %27 = arith.select %25, %21, %26 : vector<16x128xi1>, vector<16x128xf32>
    %cst_20 = arith.constant dense<0xFF800000> : vector<16xf32>
    %28 = vector.multi_reduction <maximumf>, %27, %cst_20 [1] : vector<16x128xf32> to vector<16xf32>
    %29 = vector.shape_cast %28 : vector<16xf32> to vector<16x1xf32>
    %30 = vector.broadcast %29 : vector<16x1xf32> to vector<16x128xf32>
    %31 = arith.cmpf oge, %27, %30 : vector<16x128xf32>
    %c128_i32 = arith.constant 128 : i32
    %32 = vector.broadcast %c128_i32 : i32 to vector<16x128xi32>
    %33 = arith.select %31, %23, %32 : vector<16x128xi1>, vector<16x128xi32>
    %cst_21 = arith.constant dense<2147483647> : vector<16xi32>
    %34 = vector.multi_reduction <minsi>, %33, %cst_21 [1] : vector<16x128xi32> to vector<16xi32>
    %35 = vector.shape_cast %34 : vector<16xi32> to vector<16x1xi32>
    %c0_22 = arith.constant 0 : index
    %c0_23 = arith.constant 0 : index
    %36 = vector.load %arg10[%c0_22, %c0_23] : memref<16x1xi32, #tpu.memory_space<vmem>>, vector<16x1xi32>
    tpu.vector_store %arg10[%c0_22, %c0_23], %35 {strides = array<i32>} : memref<16x1xi32, #tpu.memory_space<vmem>>, vector<16x1xi32>,
    %c0_24 = arith.constant 0 : index
    %c0_25 = arith.constant 0 : index
    %37 = vector.load %arg9[%c0_24, %c0_25] : memref<16x1xf32, #tpu.memory_space<vmem>>, vector<16x1xf32>
    tpu.vector_store %arg9[%c0_24, %c0_25], %29 {strides = array<i32>} : memref<16x1xf32, #tpu.memory_space<vmem>>, vector<16x1xf32>,
    return
  }
  func.func @transform_0(%arg0: i32) -> (i32, i32) {
    %c0_i32 = arith.constant 0 : i32
    %c0_i32_0 = arith.constant 0 : i32
    return %arg0, %c0_i32 : i32, i32
  }
  func.func @transform_1(%arg0: i32) -> (i32, i32) {
    %c0_i32 = arith.constant 0 : i32
    %c0_i32_0 = arith.constant 0 : i32
    %c0_i32_1 = arith.constant 0 : i32
    return %c0_i32, %c0_i32_0 : i32, i32
  }
  func.func @transform_2(%arg0: i32) -> (i32, i32) {
    %c0_i32 = arith.constant 0 : i32
    %c0_i32_0 = arith.constant 0 : i32
    %c0_i32_1 = arith.constant 0 : i32
    return %c0_i32, %c0_i32_0 : i32, i32
  }
  func.func @transform_3(%arg0: i32) -> (i32, i32) {
    %c0_i32 = arith.constant 0 : i32
    %c0_i32_0 = arith.constant 0 : i32
    %c0_i32_1 = arith.constant 0 : i32
    return %c0_i32, %c0_i32_0 : i32, i32
  }
  func.func @transform_4(%arg0: i32) -> (i32, i32) {
    %c0_i32 = arith.constant 0 : i32
    %c0_i32_0 = arith.constant 0 : i32
    %c0_i32_1 = arith.constant 0 : i32
    return %c0_i32, %c0_i32_0 : i32, i32
  }
  func.func @transform_5(%arg0: i32) -> (i32, i32) {
    %c0_i32 = arith.constant 0 : i32
    %c0_i32_0 = arith.constant 0 : i32
    %c0_i32_1 = arith.constant 0 : i32
    return %c0_i32, %c0_i32_0 : i32, i32
  }
  func.func @transform_6(%arg0: i32) -> (i32, i32) {
    %c0_i32 = arith.constant 0 : i32
    %c0_i32_0 = arith.constant 0 : i32
    %c0_i32_1 = arith.constant 0 : i32
    return %c0_i32, %c0_i32_0 : i32, i32
  }
  func.func @transform_7(%arg0: i32) -> (i32, i32) {
    %c0_i32 = arith.constant 0 : i32
    %c0_i32_0 = arith.constant 0 : i32
    return %arg0, %c0_i32 : i32, i32
  }
  func.func @transform_8(%arg0: i32) -> (i32, i32) {
    %c0_i32 = arith.constant 0 : i32
    %c0_i32_0 = arith.constant 0 : i32
    return %arg0, %c0_i32 : i32, i32
  }
  func.func @transform_9(%arg0: i32) -> (i32, i32) {
    %c0_i32 = arith.constant 0 : i32
    %c0_i32_0 = arith.constant 0 : i32
    return %arg0, %c0_i32 : i32, i32
  }
}

</mosaic_0001>

<bundles_post_ra>
// kernel: qfunction_forward.1
= control target key start
LH: loop header
LB: loop body
LE: loop exit
PB: predicated region body
PF: predicated region fallthrough
CT: control target
= control target key end

     0   :  { %15 = vsyncpa [#allocation3], 0  ;;  %s1791_s0 = inlined_call_operand.vmem [shape: bf16[2,128], index: 0, kind: input, shape index: {}]   ;;  %s1792_s1 = inlined_call_operand.hbm [shape: bf16[128,512], index: 1, kind: input, shape index: {}]   ;;  %s1793_s2 = inlined_call_operand.vmem [shape: f32[1,512], index: 2, kind: input, shape index: {}]   ;;  %s1794_s3 = inlined_call_operand.hbm [shape: bf16[512,256], index: 3, kind: input, shape index: {}]   ;;  %s1795_s4 = inlined_call_operand.vmem [shape: f32[1,256], index: 4, kind: input, shape index: {}]   ;;  %s1796_s5 = inlined_call_operand.hbm [shape: bf16[256,128], index: 5, kind: input, shape index: {}]   ;;  %s1797_s6 = inlined_call_operand.vmem [shape: f32[1,128], index: 6, kind: input, shape index: {}]   ;;  %s1798_s7 = inlined_call_operand.hbm [shape: f32[2,128], index: 7, kind: output, shape index: {0}]   ;;  %s1799_s8 = inlined_call_operand.vmem [shape: f32[2,1], index: 8, kind: output, shape index: {1}]   ;;  %s1800_s9 = inlined_call_operand.vmem [shape: s32[2,1], index: 9, kind: output, shape index: {2}]  }
   0x1   :  { %16 = vsyncpa [#allocation6], 0 }
   0x2   :  { %17 = vsyncpa [#allocation4], 0  ;;  %s1657_s30 = smov [#allocation5]  }
   0x3   :  { %s39_s10 = sshll.u32 %s1657_s30, 4  ;;  %s40_s10 = int_to_ptr.vmem [resolvable:$true] %s39_s10 }
   0x4   :  { %s1579_s11 = scalar_lea.vmem %s40_s10, 8192  ;;  %p1584_p1 = scmp.lt.s32.totalorder %s40_s10, %s40_s10 }
   0x5   :  { %p1580_p0 = scmp.ne.s32.totalorder %s40_s10, %s1579_s11  ;;  %p1585_p2 = scmp.lt.s32.totalorder %s1579_s11, %s1579_s11 }
   0x7   :  { %p1586_p3 = por %p1585_p2, %p1584_p1 }
   0x9   :  { %p1587_p4 = pnand %p1586_p3, %p1580_p0 }
   0xb   :  { %1590 = shalt.err (!%p1587_p4)
}
   0xc   :  { %s1658_s12 = smov 128   ;;  %s1659_s13 = smov 8  }
   0xd   :  { %45 = dma.hbm_to_vmem [thread:$0]  %s1794_s3, 8192, %s40_s10, [#allocation6], %s1658_s12, %s1658_s12, %s1659_s13  }
   0xe   :  { %s1660_s16 = smov [#allocation2]  }
   0xf   :  { %s25_s17 = sshll.u32 %s1660_s16, 4  ;;  %s26_s17 = int_to_ptr.vmem [resolvable:$true] %s25_s17 }
  0x10   :  { %s1599_s18 = scalar_lea.vmem %s26_s17, 4096  ;;  %p1604_p6 = scmp.lt.s32.totalorder %s26_s17, %s26_s17 }
  0x11   :  { %p1600_p5 = scmp.ne.s32.totalorder %s26_s17, %s1599_s18  ;;  %p1605_p7 = scmp.lt.s32.totalorder %s1599_s18, %s1599_s18 }
  0x13   :  { %p1606_p8 = por %p1605_p7, %p1604_p6 }
  0x15   :  { %p1607_p9 = pnand %p1606_p8, %p1600_p5 }
  0x17   :  { %1610 = shalt.err (!%p1607_p9)
}
  0x18   :  { %s1661_s19 = smov 256   ;;  %s1662_s20 = smov 16  }
  0x19   :  { %31 = dma.hbm_to_vmem [thread:$0]  %s1792_s1, 4096, %s26_s17, [#allocation3], %s1661_s19, %s1661_s19, %s1662_s20  }
  0x1a   :  { %s1663_s23 = smov [#allocation7]  }
  0x1b   :  { %s53_s24 = sshll.u32 %s1663_s23, 4  ;;  %s54_s24 = int_to_ptr.vmem [resolvable:$true] %s53_s24 }
  0x1c   :  { %s1619_s3 = scalar_lea.vmem %s54_s24, 2048  ;;  %p1624_p11 = scmp.lt.s32.totalorder %s54_s24, %s54_s24 }
  0x1d   :  { %p1620_p10 = scmp.ne.s32.totalorder %s54_s24, %s1619_s3  ;;  %p1625_p12 = scmp.lt.s32.totalorder %s1619_s3, %s1619_s3 }
  0x1f   :  { %p1626_p13 = por %p1625_p12, %p1624_p11 }
  0x21   :  { %p1627_p0 = pnand %p1626_p13, %p1620_p10 }
  0x23   :  { %1630 = shalt.err (!%p1627_p0)
}
  0x24   :  { %s1664_s25 = smov 64   ;;  %s1665_s26 = smov 4  }
  0x25   :  { %59 = dma.hbm_to_vmem [thread:$0]  %s1796_s5, 2048, %s54_s24, [#allocation6], %s1664_s25, %s1664_s25, %s1665_s26  }
  0x26   :  { %1651 = dma.done.wait [#allocation3], 4096  }
  0x27   :  { %1652 = vsyncadd [#allocation3], 4294963200 }
  0x28   :  { %1653 = dma.done.wait [#allocation6], 10240  }
  0x29   :  { %1654 = vsyncadd [#allocation6], 4294957056  ;;  %v1666_v0 = vmov 0   ;;  %v1411_v1 = vld [vmem:[#allocation2 + $0xe4] ss:$16 sps:$4 sm:$0xff]   ;;  %v114_v18 = vlaneseq  ;;  %vm1157_vm1 = vcmask 7168  }
  0x2a   :  { %384 = vmatprep.mubr.bf16.mxu0 %v1666_v0  ;;  %427 = vmatprep.mubr.bf16.mxu1 %v1666_v0  ;;  %v1413_v2 = vld [vmem:[#allocation2 + $0xec] ss:$16 sps:$4 sm:$0xff]   ;;  %v1415_v3 = vld [vmem:[#allocation2 + $0xe0] ss:$16 sps:$4 sm:$0xff]   ;;  %v1416_v4 = vld [vmem:[#allocation2 + $0xe8] ss:$16 sps:$4 sm:$0xff]  }
  0x2b   :  { %352 = vmatprep.subr.bf16.mxu0 %v1411_v1  ;;  %395 = vmatprep.subr.bf16.mxu1 %v1413_v2  ;;  %v1417_v5 = vld [vmem:[#allocation2 + $0xc4] ss:$16 sps:$4 sm:$0xff]   ;;  %v1419_v6 = vld [vmem:[#allocation2 + $0xcc] ss:$16 sps:$4 sm:$0xff]   ;;  %v1421_v7 = vld [vmem:[#allocation2 + $0xc0] ss:$16 sps:$4 sm:$0xff]  }
  0x2c   :  { %353 = vmatpush1.bf16.msra.mxu0 %v1415_v3  ;;  %396 = vmatpush1.bf16.msra.mxu1 %v1416_v4  ;;  %v1422_v8 = vld [vmem:[#allocation2 + $0xc8] ss:$16 sps:$4 sm:$0xff]   ;;  %v1423_v9 = vld [vmem:[#allocation2 + $0xa4] ss:$16 sps:$4 sm:$0xff]   ;;  %v1425_v10 = vld [vmem:[#allocation2 + $0xac] ss:$16 sps:$4 sm:$0xff]  }
  0x2d   :  { %354 = vmatprep.subr.bf16.mxu0 %v1417_v5  ;;  %397 = vmatprep.subr.bf16.mxu1 %v1419_v6  ;;  %v1427_v11 = vld [vmem:[#allocation2 + $0xa0] ss:$16 sps:$4 sm:$0xff]   ;;  %v1428_v12 = vld [vmem:[#allocation2 + $0xa8] ss:$16 sps:$4 sm:$0xff]   ;;  %v1429_v13 = vld [vmem:[#allocation2 + $0x84] ss:$16 sps:$4 sm:$0xff]  }
  0x2e   :  { %v1431_v14 = vld [vmem:[#allocation2 + $0x8c] ss:$16 sps:$4 sm:$0xff]   ;;  %v1433_v15 = vld [vmem:[#allocation2 + $0x80] ss:$16 sps:$4 sm:$0xff]   ;;  %v1434_v16 = vld [vmem:[#allocation2 + $0x88] ss:$16 sps:$4 sm:$0xff]  }
  0x2f   :  { %v1435_v17 = vld [vmem:[#allocation2 + $0x64] ss:$16 sps:$4 sm:$0xff]   ;;  %v1667_v19 = vmov 1966171168   ;;  %v1437_v21 = vld [vmem:[#allocation2 + $0x6c] ss:$16 sps:$4 sm:$0xff]  }
  0x30   :  { %355 = vmatpush1.bf16.msra.mxu0 %v1421_v7  ;;  %398 = vmatpush1.bf16.msra.mxu1 %v1422_v8  ;;  %v147_v20 = vunpack.c.l.s4 %v1667_v19  ;;  %v1439_v22 = vld [vmem:[#allocation2 + $0x60] ss:$16 sps:$4 sm:$0xff]   ;;  %v1440_v23 = vld [vmem:[#allocation2 + $0x68] ss:$16 sps:$4 sm:$0xff]   ;;  %v1441_v24 = vld [vmem:[#allocation2 + $0x44] ss:$16 sps:$4 sm:$0xff]  }
  0x31   :  { %356 = vmatprep.subr.bf16.mxu0 %v1423_v9  ;;  %399 = vmatprep.subr.bf16.mxu1 %v1425_v10  ;;  %v1731_v25 = vshrl.u32 %v114_v18, 7  ;;  %v1443_v27 = vld [vmem:[#allocation2 + $0x4c] ss:$16 sps:$4 sm:$0xff]   ;;  %v1445_v28 = vld [vmem:[#allocation2 + $0x40] ss:$16 sps:$4 sm:$0xff]  }
  0x32   :  { %v148_v26 = vunpack.c.0.s8 %v147_v20  ;;  %v1446_v29 = vld [vmem:[#allocation2 + $0x48] ss:$16 sps:$4 sm:$0xff]   ;;  %v1447_v30 = vld [vmem:[#allocation2 + $0x24] ss:$16 sps:$4 sm:$0xff]   ;;  %v1449_v32 = vld [vmem:[#allocation2 + $0x2c] ss:$16 sps:$4 sm:$0xff]  }
  0x33   :  { %v72_v33 = vld [vmem:[%s1791_s0] sm:$0x1]  ;;  %v73_v34 = vld [vmem:[%s1791_s0 + $0x1] sm:$0x1]  ;;  %v1452_v36 = vld [vmem:[#allocation2 + $0x28] ss:$16 sps:$4 sm:$0xff]  }
  0x34   :  { %357 = vmatpush1.bf16.msra.mxu0 %v1427_v11  ;;  %400 = vmatpush1.bf16.msra.mxu1 %v1428_v12  ;;  %v151_v31 = vsub.s32 %v148_v26, %v1731_v25  ;;  %v1451_v35 = vld [vmem:[#allocation2 + $0x20] ss:$16 sps:$4 sm:$0xff]   ;;  %v76_v39 = vld [vmem:[%s1791_s0 + $0x4] sm:$0x1]  ;;  %v142_v40 = vcombine.low %v72_v33, %v73_v34  ;;  %v77_v41 = vld [vmem:[%s1791_s0 + $0x5] sm:$0x1] }
  0x35   :  { %358 = vmatprep.subr.bf16.mxu0 %v1429_v13  ;;  %401 = vmatprep.subr.bf16.mxu1 %v1431_v14  ;;  %v74_v37 = vld [vmem:[%s1791_s0 + $0x2] sm:$0x1]  ;;  %v75_v38 = vld [vmem:[%s1791_s0 + $0x3] sm:$0x1]  ;;  %v78_v42 = vld [vmem:[%s1791_s0 + $0x6] sm:$0x1]  ;;  %v144_v46 = vcombine.low %v76_v39, %v77_v41 }
  0x36   :  { %v79_v43 = vld [vmem:[%s1791_s0 + $0x7] sm:$0x1]  ;;  %v143_v44 = vcombine.low %v74_v37, %v75_v38  ;;  %v152_v48 = vrot.slane %v142_v40, %v151_v31  ;;  %v1455_v49 = vld [vmem:[#allocation2 + $0xc] ss:$16 sps:$4 sm:$0xff]   ;;  %v1457_v53 = vld [vmem:[#allocation2] ss:$16 sps:$4 sm:$0xff]  }
  0x37   :  { %v1453_v45 = vld [vmem:[#allocation2 + $0x4] ss:$16 sps:$4 sm:$0xff]   ;;  %v145_v47 = vcombine.low %v78_v42, %v79_v43  ;;  %v166_v51 = vrot.slane %v144_v46, %v151_v31  ;;  %v1458_v54 = vld [vmem:[#allocation2 + $0x8] ss:$16 sps:$4 sm:$0xff]  }
  0x38   :  { %359 = vmatpush1.bf16.msra.mxu0 %v1433_v15  ;;  %402 = vmatpush1.bf16.msra.mxu1 %v1434_v16  ;;  %v159_v50 = vrot.slane %v143_v44, %v151_v31  ;;  %v1461_v57 = vld [vmem:[#allocation5 + $0x74] ss:$8 sps:$4 sm:$0xff]   ;;  %v1459_v61 = vld [vmem:[#allocation5 + $0x70] ss:$8 sps:$4 sm:$0xff]   ;;  %v1467_v0 = vld [vmem:[#allocation5 + $0x64] ss:$8 sps:$4 sm:$0xff]  }
  0x39   :  { %360 = vmatprep.subr.bf16.mxu0 %v1435_v17  ;;  %403 = vmatprep.subr.bf16.mxu1 %v1437_v21  ;;  %v173_v52 = vrot.slane %v145_v47, %v151_v31  ;;  %v1464_v59 = vld [vmem:[#allocation5 + $0x174] ss:$8 sps:$4 sm:$0xff]   ;;  %v1462_v62 = vld [vmem:[#allocation5 + $0x170] ss:$8 sps:$4 sm:$0xff]   ;;  %v1470_v1 = vld [vmem:[#allocation5 + $0x164] ss:$8 sps:$4 sm:$0xff]  }
  0x3a   :  { %v174_v55 = vcombine.low %v152_v48, %v159_v50  ;;  %v1465_v2 = vld [vmem:[#allocation5 + $0x60] ss:$8 sps:$4 sm:$0xff]   ;;  %v1473_v4 = vld [vmem:[#allocation5 + $0x54] ss:$8 sps:$4 sm:$0xff]   ;;  %v1471_v6 = vld [vmem:[#allocation5 + $0x50] ss:$8 sps:$4 sm:$0xff]  }
  0x3b   :  { %v175_v56 = vcombine.low %v166_v51, %v173_v52  ;;  %v1468_v3 = vld [vmem:[#allocation5 + $0x160] ss:$8 sps:$4 sm:$0xff]   ;;  %v1476_v5 = vld [vmem:[#allocation5 + $0x154] ss:$8 sps:$4 sm:$0xff]   ;;  %v1474_v7 = vld [vmem:[#allocation5 + $0x150] ss:$8 sps:$4 sm:$0xff]  }
  0x3c   :  { %361 = vmatpush1.bf16.msra.mxu0 %v1439_v22  ;;  %404 = vmatpush1.bf16.msra.mxu1 %v1440_v23  ;;  %v182_v58 = vrot.slane %v174_v55, %v151_v31  ;;  %v1479_v8 = vld [vmem:[#allocation5 + $0x44] ss:$8 sps:$4 sm:$0xff]   ;;  %v1477_v10 = vld [vmem:[#allocation5 + $0x40] ss:$8 sps:$4 sm:$0xff]   ;;  %v1485_v12 = vld [vmem:[#allocation5 + $0x34] ss:$8 sps:$4 sm:$0xff]  }
  0x3d   :  { %362 = vmatprep.subr.bf16.mxu0 %v1441_v24  ;;  %405 = vmatprep.subr.bf16.mxu1 %v1443_v27  ;;  %v189_v60 = vrot.slane %v175_v56, %v151_v31  ;;  %v1482_v9 = vld [vmem:[#allocation5 + $0x144] ss:$8 sps:$4 sm:$0xff]   ;;  %v1480_v11 = vld [vmem:[#allocation5 + $0x140] ss:$8 sps:$4 sm:$0xff]   ;;  %v1488_v13 = vld [vmem:[#allocation5 + $0x134] ss:$8 sps:$4 sm:$0xff]  }
  0x3e   :  { %v1483_v14 = vld [vmem:[#allocation5 + $0x30] ss:$8 sps:$4 sm:$0xff]   ;;  %v1491_v16 = vld [vmem:[#allocation5 + $0x24] ss:$8 sps:$4 sm:$0xff]   ;;  %v1489_v19 = vld [vmem:[#allocation5 + $0x20] ss:$8 sps:$4 sm:$0xff]  }
  0x3f   :  { %v190_v63 = vcombine.low %v182_v58, %v189_v60  ;;  %v1486_v15 = vld [vmem:[#allocation5 + $0x130] ss:$8 sps:$4 sm:$0xff]   ;;  %v1494_v17 = vld [vmem:[#allocation5 + $0x124] ss:$8 sps:$4 sm:$0xff]   ;;  %v1492_v20 = vld [vmem:[#allocation5 + $0x120] ss:$8 sps:$4 sm:$0xff]  }
  0x40   :  { %363 = vmatpush1.bf16.msra.mxu0 %v1445_v28  ;;  %406 = vmatpush1.bf16.msra.mxu1 %v1446_v29  ;;  %v1497_v21 = vld [vmem:[#allocation5 + $0x14] ss:$8 sps:$4 sm:$0xff]   ;;  %v1495_v23 = vld [vmem:[#allocation5 + $0x10] ss:$8 sps:$4 sm:$0xff]   ;;  %v1503_v26 = vld [vmem:[#allocation5 + $0x4] ss:$8 sps:$4 sm:$0xff]  }
  0x41   :  { %364 = vmatprep.subr.bf16.mxu0 %v1447_v30  ;;  %407 = vmatprep.subr.bf16.mxu1 %v1449_v32  ;;  %v1500_v22 = vld [vmem:[#allocation5 + $0x114] ss:$8 sps:$4 sm:$0xff]   ;;  %v1498_v24 = vld [vmem:[#allocation5 + $0x110] ss:$8 sps:$4 sm:$0xff]   ;;  %v1506_v27 = vld [vmem:[#allocation5 + $0x104] ss:$8 sps:$4 sm:$0xff]  }
  0x42   :  { %v1501_v28 = vld [vmem:[#allocation5] ss:$8 sps:$4 sm:$0xff]   ;;  %v1509_v30 = vld [vmem:[#allocation5 + $0xf4] ss:$8 sps:$4 sm:$0xff]   ;;  %v1507_v32 = vld [vmem:[#allocation5 + $0xf0] ss:$8 sps:$4 sm:$0xff]  }
  0x43   :  { %v1504_v29 = vld [vmem:[#allocation5 + $0x100] ss:$8 sps:$4 sm:$0xff]   ;;  %v1512_v31 = vld [vmem:[#allocation5 + $0x1f4] ss:$8 sps:$4 sm:$0xff]   ;;  %v1510_v33 = vld [vmem:[#allocation5 + $0x1f0] ss:$8 sps:$4 sm:$0xff]  }
  0x44   :  { %365 = vmatpush1.bf16.msra.mxu0 %v1451_v35  ;;  %408 = vmatpush1.bf16.msra.mxu1 %v1452_v36  ;;  %v1515_v34 = vld [vmem:[#allocation5 + $0xe4] ss:$8 sps:$4 sm:$0xff]   ;;  %v1513_v36 = vld [vmem:[#allocation5 + $0xe0] ss:$8 sps:$4 sm:$0xff]   ;;  %v1521_v38 = vld [vmem:[#allocation5 + $0xd4] ss:$8 sps:$4 sm:$0xff]  }
  0x45   :  { %366 = vmatprep.subr.bf16.mxu0 %v1453_v45  ;;  %409 = vmatprep.subr.bf16.mxu1 %v1455_v49  ;;  %v1518_v35 = vld [vmem:[#allocation5 + $0x1e4] ss:$8 sps:$4 sm:$0xff]   ;;  %v1516_v37 = vld [vmem:[#allocation5 + $0x1e0] ss:$8 sps:$4 sm:$0xff]   ;;  %v1524_v39 = vld [vmem:[#allocation5 + $0x1d4] ss:$8 sps:$4 sm:$0xff]  }
  0x46   :  { %v1519_v40 = vld [vmem:[#allocation5 + $0xd0] ss:$8 sps:$4 sm:$0xff]   ;;  %v1527_v42 = vld [vmem:[#allocation5 + $0xc4] ss:$8 sps:$4 sm:$0xff]   ;;  %v1525_v44 = vld [vmem:[#allocation5 + $0xc0] ss:$8 sps:$4 sm:$0xff]  }
  0x47   :  { %v1522_v41 = vld [vmem:[#allocation5 + $0x1d0] ss:$8 sps:$4 sm:$0xff]   ;;  %v1530_v43 = vld [vmem:[#allocation5 + $0x1c4] ss:$8 sps:$4 sm:$0xff]   ;;  %v1528_v45 = vld [vmem:[#allocation5 + $0x1c0] ss:$8 sps:$4 sm:$0xff]  }
  0x48   :  { %367 = vmatpush1.bf16.msra.mxu0 %v1457_v53  ;;  %410 = vmatpush1.bf16.msra.mxu1 %v1458_v54  ;;  %v1533_v46 = vld [vmem:[#allocation5 + $0xb4] ss:$8 sps:$4 sm:$0xff]   ;;  %v1531_v48 = vld [vmem:[#allocation5 + $0xb0] ss:$8 sps:$4 sm:$0xff]   ;;  %v1539_v50 = vld [vmem:[#allocation5 + $0xa4] ss:$8 sps:$4 sm:$0xff]  }
  0x49   :  { %846 = vmatprep.subr.bf16.mxu0 %v1461_v57  ;;  %889 = vmatprep.subr.bf16.mxu1 %v1464_v59  ;;  %v1536_v47 = vld [vmem:[#allocation5 + $0x1b4] ss:$8 sps:$4 sm:$0xff]   ;;  %v1534_v49 = vld [vmem:[#allocation5 + $0x1b0] ss:$8 sps:$4 sm:$0xff]   ;;  %v1542_v51 = vld [vmem:[#allocation5 + $0x1a4] ss:$8 sps:$4 sm:$0xff]  }
  0x4a   :  { %v1537_v52 = vld [vmem:[#allocation5 + $0xa0] ss:$8 sps:$4 sm:$0xff]   ;;  %v1545_v54 = vld [vmem:[#allocation5 + $0x94] ss:$8 sps:$4 sm:$0xff]   ;;  %v1543_v56 = vld [vmem:[#allocation5 + $0x90] ss:$8 sps:$4 sm:$0xff]  }
  0x4b   :  { %385 = vmatmul.mubr.bf16.vlgmr.msra.gmra.mxu0 %v190_v63  ;;  %428 = vmatmul.mubr.bf16.vlgmr.msra.gmra.mxu1 %v190_v63  ;;  %v1540_v53 = vld [vmem:[#allocation5 + $0x1a0] ss:$8 sps:$4 sm:$0xff]   ;;  %v1548_v55 = vld [vmem:[#allocation5 + $0x194] ss:$8 sps:$4 sm:$0xff]   ;;  %v1546_v57 = vld [vmem:[#allocation5 + $0x190] ss:$8 sps:$4 sm:$0xff]  }
  0x4c   :  { %847 = vmatpush1.bf16.msra.mxu0 %v1459_v61  ;;  %890 = vmatpush1.bf16.msra.mxu1 %v1462_v62  ;;  %v1551_v58 = vld [vmem:[#allocation5 + $0x84] ss:$8 sps:$4 sm:$0xff]   ;;  %v1549_v60 = vld [vmem:[#allocation5 + $0x80] ss:$8 sps:$4 sm:$0xff]   ;;  %v1555_v62 = vld [vmem:[#allocation7 + $0x78] sm:$0xff]   ;;  %v120_v63 = vsub.s32 1, %v1731_v25 }
  0x4d   :  { %848 = vmatprep.subr.bf16.mxu0 %v1467_v0  ;;  %891 = vmatprep.subr.bf16.mxu1 %v1470_v1  ;;  %v1554_v59 = vld [vmem:[#allocation5 + $0x184] ss:$8 sps:$4 sm:$0xff]   ;;  %v1552_v61 = vld [vmem:[#allocation5 + $0x180] ss:$8 sps:$4 sm:$0xff]   ;;  %v128_v0 = vsub.s32 3, %v1731_v25  ;;  %v116_v1 = vsub.s32 0, %v1731_v25 }
  0x50   :  { %849 = vmatpush1.bf16.msra.mxu0 %v1465_v2  ;;  %892 = vmatpush1.bf16.msra.mxu1 %v1468_v3  ;;  %v124_v2 = vsub.s32 2, %v1731_v25  ;;  %v112_v3 = vld [vmem:[%s1793_s2] sm:$0xf] }
  0x51   :  { %850 = vmatprep.subr.bf16.mxu0 %v1473_v4  ;;  %893 = vmatprep.subr.bf16.mxu1 %v1476_v5 }
  0x54   :  { %851 = vmatpush1.bf16.msra.mxu0 %v1471_v6  ;;  %894 = vmatpush1.bf16.msra.mxu1 %v1474_v7  ;;  %v121_v6 = vrot.slane %v112_v3, %v120_v63  ;;  %v129_v7 = vrot.slane %v112_v3, %v128_v0 }
  0x55   :  { %852 = vmatprep.subr.bf16.mxu0 %v1479_v8  ;;  %895 = vmatprep.subr.bf16.mxu1 %v1482_v9  ;;  %v117_v8 = vrot.slane %v112_v3, %v116_v1  ;;  %v125_v9 = vrot.slane %v112_v3, %v124_v2 }
  0x58   :  { %853 = vmatpush1.bf16.msra.mxu0 %v1477_v10  ;;  %896 = vmatpush1.bf16.msra.mxu1 %v1480_v11 }
  0x59   :  { %854 = vmatprep.subr.bf16.mxu0 %v1485_v12  ;;  %897 = vmatprep.subr.bf16.mxu1 %v1488_v13 }
  0x5c   :  { %855 = vmatpush1.bf16.msra.mxu0 %v1483_v14  ;;  %898 = vmatpush1.bf16.msra.mxu1 %v1486_v15 }
  0x5d   :  { %856 = vmatprep.subr.bf16.mxu0 %v1491_v16  ;;  %899 = vmatprep.subr.bf16.mxu1 %v1494_v17 }
  0x60   :  { %857 = vmatpush1.bf16.msra.mxu0 %v1489_v19  ;;  %900 = vmatpush1.bf16.msra.mxu1 %v1492_v20 }
  0x61   :  { %858 = vmatprep.subr.bf16.mxu0 %v1497_v21  ;;  %901 = vmatprep.subr.bf16.mxu1 %v1500_v22 }
  0x64   :  { %859 = vmatpush1.bf16.msra.mxu0 %v1495_v23  ;;  %902 = vmatpush1.bf16.msra.mxu1 %v1498_v24 }
  0x65   :  { %860 = vmatprep.subr.bf16.mxu0 %v1503_v26  ;;  %903 = vmatprep.subr.bf16.mxu1 %v1506_v27 }
  0x68   :  { %861 = vmatpush1.bf16.msra.mxu0 %v1501_v28  ;;  %904 = vmatpush1.bf16.msra.mxu1 %v1504_v29 }
  0x69   :  { %862 = vmatprep.subr.bf16.mxu0 %v1509_v30  ;;  %905 = vmatprep.subr.bf16.mxu1 %v1512_v31 }
  0x6c   :  { %863 = vmatpush2.bf16.msra.mxu0 %v1507_v32  ;;  %906 = vmatpush2.bf16.msra.mxu1 %v1510_v33 }
  0x6d   :  { %864 = vmatprep.subr.bf16.mxu0 %v1515_v34  ;;  %907 = vmatprep.subr.bf16.mxu1 %v1518_v35 }
  0x70   :  { %865 = vmatpush2.bf16.msra.mxu0 %v1513_v36  ;;  %908 = vmatpush2.bf16.msra.mxu1 %v1516_v37  ;;  %v1556_v36 = vld [vmem:[#allocation7 + $0x38] sm:$0xff]  }
  0x71   :  { %866 = vmatprep.subr.bf16.mxu0 %v1521_v38  ;;  %909 = vmatprep.subr.bf16.mxu1 %v1524_v39  ;;  %v1557_v39 = vld [vmem:[#allocation7 + $0x70] sm:$0xff]  }
  0x74   :  { %867 = vmatpush2.bf16.msra.mxu0 %v1519_v40  ;;  %910 = vmatpush2.bf16.msra.mxu1 %v1522_v41  ;;  %v1558_v40 = vld [vmem:[#allocation7 + $0x30] sm:$0xff]   ;;  %v1559_v41 = vld [vmem:[#allocation7 + $0x68] sm:$0xff]  }
  0x75   :  { %868 = vmatprep.subr.bf16.mxu0 %v1527_v42  ;;  %911 = vmatprep.subr.bf16.mxu1 %v1530_v43  ;;  %v1560_v42 = vld [vmem:[#allocation7 + $0x28] sm:$0xff]   ;;  %v1561_v43 = vld [vmem:[#allocation7 + $0x60] sm:$0xff]  }
  0x78   :  { %869 = vmatpush2.bf16.msra.mxu0 %v1525_v44  ;;  %912 = vmatpush2.bf16.msra.mxu1 %v1528_v45  ;;  %v1562_v44 = vld [vmem:[#allocation7 + $0x20] sm:$0xff]   ;;  %v1563_v45 = vld [vmem:[#allocation7 + $0x58] sm:$0xff]  }
  0x79   :  { %870 = vmatprep.subr.bf16.mxu0 %v1533_v46  ;;  %913 = vmatprep.subr.bf16.mxu1 %v1536_v47  ;;  %v1564_v46 = vld [vmem:[#allocation7 + $0x18] sm:$0xff]   ;;  %v1565_v47 = vld [vmem:[#allocation7 + $0x50] sm:$0xff]  }
  0x7c   :  { %871 = vmatpush2.bf16.msra.mxu0 %v1531_v48  ;;  %914 = vmatpush2.bf16.msra.mxu1 %v1534_v49  ;;  %v1566_v48 = vld [vmem:[#allocation7 + $0x10] sm:$0xff]   ;;  %v1567_v49 = vld [vmem:[#allocation7 + $0x48] sm:$0xff]  }
  0x7d   :  { %872 = vmatprep.subr.bf16.mxu0 %v1539_v50  ;;  %915 = vmatprep.subr.bf16.mxu1 %v1542_v51  ;;  %v1568_v50 = vld [vmem:[#allocation7 + $0x8] sm:$0xff]   ;;  %v1569_v51 = vld [vmem:[#allocation7 + $0x40] sm:$0xff]  }
  0x80   :  { %873 = vmatpush2.bf16.msra.mxu0 %v1537_v52  ;;  %916 = vmatpush2.bf16.msra.mxu1 %v1540_v53  ;;  %v1570_v52 = vld [vmem:[#allocation7] sm:$0xff]  }
  0x81   :  { %874 = vmatprep.subr.bf16.mxu0 %v1545_v54  ;;  %917 = vmatprep.subr.bf16.mxu1 %v1548_v55  ;;  %v514_v53 = vld [vmem:[%s1795_s4] sm:$0x3] }
  0x82   :  { %v523_v54 = vrot.slane %v514_v53, %v120_v63  ;;  %v519_v55 = vrot.slane %v514_v53, %v116_v1 }
  0x84   :  { %875 = vmatpush2.bf16.msra.mxu0 %v1543_v56  ;;  %918 = vmatpush2.bf16.msra.mxu1 %v1546_v57 }
  0x85   :  { %876 = vmatprep.subr.bf16.mxu0 %v1551_v58  ;;  %919 = vmatprep.subr.bf16.mxu1 %v1554_v59 }
  0x88   :  { %877 = vmatpush2.bf16.msra.mxu0 %v1549_v60  ;;  %920 = vmatpush2.bf16.msra.mxu1 %v1552_v61 }
  0x89   :  { %1375 = vmatprep.subr.bf16.mxu0 %v1555_v62 }
 0x10b   :  { %v386_v4 = vpop.f32.mrf.mxu0  ;;  %v429_v5 = vpop.f32.mrf.mxu1 }
 0x10c   :  { %v387_v19 = vadd.f32 %v386_v4, %v117_v8  ;;  %v430_v20 = vadd.f32 %v429_v5, %v125_v9 }
 0x10d   :  { %v388_v10 = vpop.f32.mrf.mxu0  ;;  %v431_v11 = vpop.f32.mrf.mxu1 }
 0x10e   :  { %v389_v14 = vadd.f32 %v388_v10, %v121_v6  ;;  %v432_v15 = vadd.f32 %v431_v11, %v129_v7  ;;  %v438_v32 = vmax.f32 %v387_v19, 0.0  ;;  %v440_v33 = vmax.f32 %v430_v20, 0.0 }
 0x10f   :  { %v390_v12 = vpop.f32.mrf.mxu0  ;;  %v433_v13 = vpop.f32.mrf.mxu1 }
 0x110   :  { %v391_v16 = vadd.f32 %v390_v12, %v117_v8  ;;  %v434_v17 = vadd.f32 %v433_v13, %v125_v9  ;;  %v439_v28 = vmax.f32 %v389_v14, 0.0  ;;  %v441_v29 = vmax.f32 %v432_v15, 0.0 }
 0x111   :  { %v392_v21 = vpop.f32.mrf.mxu0  ;;  %v435_v22 = vpop.f32.mrf.mxu1  ;;  %v1117_v14 = vand.u32 127, %v114_v18 }
 0x112   :  { %v393_v23 = vadd.f32 %v392_v21, %v121_v6  ;;  %v436_v24 = vadd.f32 %v435_v22, %v129_v7  ;;  %v442_v26 = vmax.f32 %v391_v16, 0.0  ;;  %v444_v27 = vmax.f32 %v434_v17, 0.0  ;;  %v1358_v16 = vld [vmem:[%s1797_s6] ss:$0 sm:$0xff] }
 0x113   :  { %vm1118_vm0 = vcmp.lt.s32.totalorder %v1117_v14, 4 }
 0x114   :  { %v443_v30 = vmax.f32 %v393_v23, 0.0  ;;  %v445_v31 = vmax.f32 %v436_v24, 0.0  ;;  %v446_v37 = vpack.c.bf16 %v442_v26, %v438_v32  ;;  %v448_v38 = vpack.c.bf16 %v444_v27, %v440_v33 }
 0x116   :  { %v447_v34 = vpack.c.bf16 %v443_v30, %v439_v28  ;;  %v449_v35 = vpack.c.bf16 %v445_v31, %v441_v29 }
 0x118   :  { %878 = vmatprep.mubr.bf16.mxu0 %v447_v34  ;;  %921 = vmatprep.mubr.bf16.mxu1 %v449_v35 }
 0x119   :  { %879 = vmatmul.mubr.bf16.vlgmr.msra.gmra.mxu0 %v446_v37  ;;  %922 = vmatmul.mubr.bf16.vlgmr.msra.gmra.mxu1 %v448_v38 }
 0x11a   :  { %1376 = vmatpush3.bf16.msra.mxu0 %v1556_v36 }
 0x11b   :  { %1377 = vmatprep.subr.bf16.mxu0 %v1557_v39 }
 0x11e   :  { %1378 = vmatpush3.bf16.msra.mxu0 %v1558_v40 }
 0x11f   :  { %1379 = vmatprep.subr.bf16.mxu0 %v1559_v41 }
 0x122   :  { %1380 = vmatpush3.bf16.msra.mxu0 %v1560_v42 }
 0x123   :  { %1381 = vmatprep.subr.bf16.mxu0 %v1561_v43 }
 0x126   :  { %1382 = vmatpush3.bf16.msra.mxu0 %v1562_v44 }
 0x127   :  { %1383 = vmatprep.subr.bf16.mxu0 %v1563_v45 }
 0x12a   :  { %1384 = vmatpush3.bf16.msra.mxu0 %v1564_v46 }
 0x12b   :  { %1385 = vmatprep.subr.bf16.mxu0 %v1565_v47 }
 0x12e   :  { %1386 = vmatpush3.bf16.msra.mxu0 %v1566_v48 }
 0x12f   :  { %1387 = vmatprep.subr.bf16.mxu0 %v1567_v49 }
 0x132   :  { %1388 = vmatpush3.bf16.msra.mxu0 %v1568_v50 }
 0x133   :  { %1389 = vmatprep.subr.bf16.mxu0 %v1569_v51 }
 0x136   :  { %1390 = vmatpush3.bf16.msra.mxu0 %v1570_v52 }
 0x1d9   :  { %v880_v56 = vpop.f32.mrf.mxu0  ;;  %v923_v57 = vpop.f32.mrf.mxu1 }
 0x1da   :  { %v881_v61 = vadd.f32 %v880_v56, %v519_v55 }
 0x1db   :  { %v882_v58 = vpop.f32.mrf.mxu0  ;;  %v925_v59 = vpop.f32.mrf.mxu1 }
 0x1dc   :  { %v883_v60 = vadd.f32 %v882_v58, %v523_v54  ;;  %v924_v7 = vadd.f32 %v923_v57, %v881_v61 }
 0x1dd   :  { %v884_v62 = vpop.f32.mrf.mxu0  ;;  %v927_v0 = vpop.f32.mrf.mxu1 }
 0x1de   :  { %v885_v2 = vadd.f32 %v884_v62, %v519_v55  ;;  %v926_v4 = vadd.f32 %v925_v59, %v883_v60  ;;  %v932_v1 = vmax.f32 %v924_v7, 0.0 }
 0x1df   :  { %v886_v3 = vpop.f32.mrf.mxu0  ;;  %v929_v8 = vpop.f32.mrf.mxu1 }
 0x1e0   :  { %v928_v5 = vadd.f32 %v927_v0, %v885_v2  ;;  %v887_v6 = vadd.f32 %v886_v3, %v523_v54  ;;  %v933_v10 = vmax.f32 %v926_v4, 0.0 }
 0x1e2   :  { %v930_v9 = vadd.f32 %v929_v8, %v887_v6  ;;  %v934_v63 = vmax.f32 %v928_v5, 0.0 }
 0x1e4   :  { %v935_v25 = vmax.f32 %v930_v9, 0.0  ;;  %v936_v12 = vpack.c.bf16 %v934_v63, %v932_v1 }
 0x1e6   :  { %v937_v11 = vpack.c.bf16 %v935_v25, %v933_v10 }
 0x1e8   :  { %1105 = vmatprep.mubr.bf16.mxu0 %v937_v11 }
 0x1e9   :  { %1106 = vmatmul.mubr.bf16.vlgmr.msra.gmra.mxu0 %v936_v12 }
 0x2a9   :  { %v1391_v13 = vpop.f32.mrf.mxu0 }
 0x2ab   :  { %v1392_v15 = vpop.f32.mrf.mxu0 }
 0x2ac   :  { %v1393_v17 = vadd.f32 %v1392_v15, %v1391_v13 }
 0x2ad   :  { %v1394_v19 = vpop.f32.mrf.mxu0 }
 0x2ae   :  { %v1108_v20 = vadd.f32 %v1393_v17, %v1358_v16 }
 0x2af   :  { %v1395_v21 = vpop.f32.mrf.mxu0 }
 0x2b0   :  { %v1396_v22 = vadd.f32 %v1395_v21, %v1394_v19  ;;  %v1119_v23 = vsel %vm1118_vm0, %v1108_v20, -inf  ;;  %1114 = vst [vmem:[#allocation8] sm:$0xff] %v1108_v20 }
 0x2b1   :  { %1121 = vmax.xlane.f32.xlu0 %v1119_v23 }
 0x2b2   :  { %v1111_v24 = vadd.f32 %v1396_v22, %v1358_v16 }
 0x2b4   :  { %1115 = vst [vmem:[#allocation8 + $0x8] sm:$0xff] %v1111_v24  ;;  %v1120_v26 = vsel %vm1118_vm0, %v1111_v24, -inf }
 0x2b5   :  { %1123 = vmax.xlane.f32.xlu0 %v1120_v26 }
 0x33a   :  { %v1122_v18 = vpop.xlane.xlu0 %1121 }
 0x33b   :  { %vm1125_vm2 = vcmp.ge.f32.partialorder %v1119_v23, %v1122_v18  ;;  %1160 = vst.msk [vmem:[#allocation9] sm:$0xff] %vm1157_vm1, %v1122_v18 }
 0x33c   :  { %v1127_v27 = vsel %vm1125_vm2, %v1117_v14, 128 }
 0x33d   :  { %v1130_v28 = vshra.s32 %v1127_v27, 16  ;;  %v1129_v34 = vand.u32 65535, %v1127_v27 }
 0x33e   :  { %v1124_v29 = vpop.xlane.xlu0 %1123 }
 0x33f   :  { %vm1126_vm3 = vcmp.ge.f32.partialorder %v1120_v26, %v1124_v29  ;;  %v1132_v30 = vcvt.s32.f32 %v1130_v28  ;;  %v1131_v36 = vcvt.s32.f32 %v1129_v34 }
 0x340   :  { %v1128_v31 = vsel %vm1126_vm3, %v1117_v14, 128 }
 0x341   :  { %1133 = vmin.xlane.f32.xlu1 %v1132_v30  ;;  %v1144_v32 = vshra.s32 %v1128_v31, 16  ;;  %v1143_v37 = vand.u32 65535, %v1128_v31 }
 0x343   :  { %v1146_v33 = vcvt.s32.f32 %v1144_v32  ;;  %v1145_v40 = vcvt.s32.f32 %v1143_v37 }
 0x345   :  { %1147 = vmin.xlane.f32.xlu1 %v1146_v33 }
 0x3ca   :  { %v1134_v35 = vpop.xlane.xlu1 %1133 }
 0x3cb   :  { %vm1135_vm4 = vcmp.eq.f32.partialorder %v1132_v30, %v1134_v35  ;;  %v1140_v42 = vcvt.f32.s32 %v1134_v35 }
 0x3cc   :  { %v1136_v38 = vsel %vm1135_vm4, %v1131_v36, inf }
 0x3cd   :  { %1137 = vmin.xlane.f32.xlu0 %v1136_v38  ;;  %v1141_v44 = vshll.u32 %v1140_v42, 16 }
 0x3ce   :  { %v1148_v39 = vpop.xlane.xlu1 %1147 }
 0x3cf   :  { %vm1149_vm5 = vcmp.eq.f32.partialorder %v1146_v33, %v1148_v39 }
 0x3d0   :  { %v1150_v41 = vsel %vm1149_vm5, %v1145_v40, inf }
 0x3d1   :  { %1151 = vmin.xlane.f32.xlu1 %v1150_v41 }
 0x456   :  { %v1138_v43 = vpop.xlane.xlu0 %1137 }
 0x457   :  { %v1139_v45 = vcvt.f32.s32 %v1138_v43 }
 0x459   :  { %v1142_v46 = vadd.s32 %v1141_v44, %v1139_v45 }
 0x45a   :  { %v1152_v47 = vpop.xlane.xlu1 %1151 }
 0x45b   :  { %1158 = vst.msk [vmem:[#allocation10] sm:$0xff] %vm1157_vm1, %v1142_v46 }
 0x45c   :  { %1166 = vsyncadd [#allocation4], 224  ;;  %v1192_v48 = vld [vmem:[#allocation9] sm:$0x3]  ;;  %s1668_s6 = smov [#allocation8]  }
 0x45d   :  { %s1167_s3 = sshll.u32 %s1668_s6, 4  ;;  %1193 = vst [vmem:[%s1799_s8] sm:$0x3] %v1192_v48  ;;  %s1168_s3 = int_to_ptr.vmem [resolvable:$true] %s1167_s3 }
 0x45e   :  { %s1631_s1 = scalar_lea.vmem %s1168_s3, 32  ;;  %s1635_s5 = scalar_lea.vmem %s1168_s3, 256 }
 0x45f   :  { %p1632_p1 = scmp.ne.s32.totalorder %s1168_s3, %s1631_s1  ;;  %p1636_p2 = scmp.lt.s32.totalorder %s1168_s3, %s1168_s3 }
 0x460   :  { %p1637_p3 = scmp.lt.s32.totalorder %s1635_s5, %s1631_s1 }
 0x462   :  { %v1227_v49 = vld [vmem:[#allocation10] sm:$0x3]  ;;  %p1638_p4 = por %p1637_p3, %p1636_p2 }
 0x463   :  { %1228 = vst [vmem:[%s1800_s9] sm:$0x3] %v1227_v49 }
 0x464   :  { %p1639_p5 = pnand %p1638_p4, %p1632_p1 }
 0x466   :  { %1642 = shalt.err (!%p1639_p5)
}
 0x467   :  { %s1669_s29 = smov 32   ;;  %s1670_s30 = smov 2  }
 0x468   :  { %1173 = dma.vmem_to_hbm [thread:$0]  %s1168_s3, 32, %s1798_s7, [#allocation4], %s1669_s29, %s1669_s29, %s1670_s30  }
 0x469   :  { %1655 = dma.done.wait [#allocation4], 256  }
 0x46a   :  { %1656 = vsyncadd [#allocation4], 4294967040 }
 0x46b   :  { %1251 = vsyncpa [#allocation3], 1 }
 0x46c   :  { %1252 = vsyncpa [#allocation6], 1 }
 0x46d   :  { %1253 = vsyncpa [#allocation4], 1 }

</bundles_post_ra>
